<compile_context>
chip_gen: v7x
topology: tpu7x:2x2x1
jax: 0.10.0
libtpu: 0.0.40
codegen_flags: <defaults>
</compile_context>

<pallas_src>
import functools

import jax
import jax.numpy as jnp
from jax.experimental import pallas as pl
from jax.experimental.pallas import tpu as pltpu


def _round_up(x, m):
    return ((x + m - 1) // m) * m


def mlp_kernel(x_ref, w1_ref, b1_ref, w2_ref, b2_ref, o_ref):
    # hidden = relu(x @ W1 + b1)    (f32 accumulation on the MXU)
    h = jnp.dot(x_ref[...], w1_ref[...], preferred_element_type=jnp.float32)
    h = jnp.maximum(h + b1_ref[...], 0.0)
    # out = hidden @ W2 + b2
    o = jnp.dot(h.astype(w2_ref.dtype), w2_ref[...],
                preferred_element_type=jnp.float32)
    o_ref[...] = (o + b2_ref[...]).astype(o_ref.dtype)


@functools.partial(jax.jit, static_argnames=("compute_dtype", "max_tb"))
def my_mlp_forward(x, w1, b1, w2, b2, *, compute_dtype=None, max_tb=256):
    """Fused 2-layer MLP. Weights are (in_features, out_features) (pre-transposed)."""
    B, d_in = x.shape
    hidden = w1.shape[1]
    d_out = w2.shape[1]
    assert w1.shape[0] == d_in and w2.shape[0] == hidden
    if compute_dtype is None:
        compute_dtype = x.dtype  # pass jnp.bfloat16 on v6e/v7x hot paths

    # Lane-dense (128-multiple) padded dims.
    d_in_p = _round_up(d_in, 128)
    hid_p = _round_up(hidden, 128)
    d_out_p = _round_up(d_out, 128)

    # Batch tile: collapse to one grid step when B is small, else 256-row tiles.
    if B <= max_tb:
        tb = _round_up(max(B, 8), 8)
    else:
        tb = max_tb
    B_p = _round_up(B, tb)

    # Zero-padded operands (exact: padding contributes nothing; extra output
    # columns/rows are sliced off below).  Biases stay f32.
    xp = jnp.zeros((B_p, d_in_p), compute_dtype).at[:B, :d_in].set(
        x.astype(compute_dtype))
    w1p = jnp.zeros((d_in_p, hid_p), compute_dtype).at[:d_in, :hidden].set(
        w1.astype(compute_dtype))
    b1p = jnp.zeros((1, hid_p), jnp.float32).at[:, :hidden].set(
        b1.reshape(1, -1).astype(jnp.float32))
    w2p = jnp.zeros((hid_p, d_out_p), compute_dtype).at[:hidden, :d_out].set(
        w2.astype(compute_dtype))
    b2p = jnp.zeros((1, d_out_p), jnp.float32).at[:, :d_out].set(
        b2.reshape(1, -1).astype(jnp.float32))

    # VMEM footprint at max tile (tb=256, 128-padded dims, f32):
    #   x/out blocks 2*2*128 KiB double-buffered + resident weights/biases
    #   ~128 KiB -> far under the 16 MiB v5e / 32 MiB v6e/v7x scoped defaults,
    #   so no vmem_limit_bytes override is needed.
    out_p = pl.pallas_call(
        mlp_kernel,
        out_shape=jax.ShapeDtypeStruct((B_p, d_out_p), x.dtype),
        grid_spec=pltpu.PrefetchScalarGridSpec(
            num_scalar_prefetch=0,
            grid=(B_p // tb,),
            in_specs=[
                pl.BlockSpec((tb, d_in_p), lambda i: (i, 0)),
                # Weights/biases are grid-invariant (constant index_map) so the
                # pipeline does not re-DMA them across batch tiles.
                # TODO(synk): K-tile / single-buffer the weights once
                # hidden*d_in grows toward the v7x 32 MiB scoped-VMEM budget.
                pl.BlockSpec((d_in_p, hid_p), lambda i: (0, 0)),
                pl.BlockSpec((1, hid_p), lambda i: (0, 0)),
                pl.BlockSpec((hid_p, d_out_p), lambda i: (0, 0)),
                pl.BlockSpec((1, d_out_p), lambda i: (0, 0)),
            ],
            out_specs=pl.BlockSpec((tb, d_out_p), lambda i: (i, 0)),
        ),
        compiler_params=pltpu.CompilerParams(
            dimension_semantics=("parallel",),
        ),
    )(xp, w1p, b1p, w2p, b2p)

    return out_p[:B, :d_out]


if __name__ == "__main__":
    # myMLP(input_size=32, output_size=16, mlp_layers=[128]), batch=16.
    B, D_IN, HIDDEN, D_OUT = 16, 32, 128, 16

    key = jax.random.PRNGKey(0)
    kx, kw1, kb1, kw2, kb2 = jax.random.split(key, 5)

    x = jax.random.normal(kx, (B, D_IN), dtype=jnp.float32)

    # Deterministic params, mimicking PyTorch Linear's U(-1/sqrt(fan_in), ..),
    # stored pre-transposed as (in_features, out_features).
    bound1 = 1.0 / jnp.sqrt(D_IN)
    w1 = jax.random.uniform(kw1, (D_IN, HIDDEN), jnp.float32, -bound1, bound1)
    b1 = jax.random.uniform(kb1, (1, HIDDEN), jnp.float32, -bound1, bound1)
    bound2 = 1.0 / jnp.sqrt(HIDDEN)
    w2 = jax.random.uniform(kw2, (HIDDEN, D_OUT), jnp.float32, -bound2, bound2)
    b2 = jax.random.uniform(kb2, (1, D_OUT), jnp.float32, -bound2, bound2)

    ref_fn = lambda a: jnp.maximum(a @ w1 + b1, 0.0) @ w2 + b2

    # Main check (f32, single grid step).
    out = jax.block_until_ready(my_mlp_forward(x, w1, b1, w2, b2))
    assert out.shape == (B, D_OUT)
    assert jnp.allclose(out, ref_fn(x), atol=1e-5, rtol=1e-5)

    # Ragged batch check (B=20 not a multiple of 8 -> padded internally).
    x20 = jax.random.normal(jax.random.PRNGKey(1), (20, D_IN), dtype=jnp.float32)
    out20 = jax.block_until_ready(my_mlp_forward(x20, w1, b1, w2, b2))
    assert out20.shape == (20, D_OUT)
    assert jnp.allclose(out20, ref_fn(x20), atol=1e-5, rtol=1e-5)

    # Multi-tile batch check (B=300 -> two 256-row "parallel" grid steps).
    x300 = jax.random.normal(jax.random.PRNGKey(2), (300, D_IN), dtype=jnp.float32)
    out300 = jax.block_until_ready(my_mlp_forward(x300, w1, b1, w2, b2))
    assert out300.shape == (300, D_OUT)
    assert jnp.allclose(out300, ref_fn(x300), atol=1e-5, rtol=1e-5)

    print("KERNEL_OK")
</pallas_src>

<mosaic_0001>
module attributes {stable_mosaic.version = 11 : i64} {
  func.func @mlp_kernel(%arg0: i32, %arg1: memref<16x128xf32, #tpu.memory_space<vmem>>, %arg2: memref<128x128xf32, #tpu.memory_space<vmem>>, %arg3: memref<1x128xf32, #tpu.memory_space<vmem>>, %arg4: memref<128x128xf32, #tpu.memory_space<vmem>>, %arg5: memref<1x128xf32, #tpu.memory_space<vmem>>, %arg6: memref<16x128xf32, #tpu.memory_space<vmem>>) attributes {dimension_semantics = [#tpu.dimension_semantics<parallel>], iteration_bounds = array<i64: 1>, scalar_prefetch = 0 : i64, scratch_operands = 0 : i64, tpu.core_type = #tpu.core_type<tc>, window_params = [{transform_indices = @transform_0, window_bounds = array<i64: 16, 128>}, {pipeline_mode = #tpu.pipeline_mode<synchronous>, transform_indices = @transform_1, window_bounds = array<i64: 128, 128>}, {pipeline_mode = #tpu.pipeline_mode<synchronous>, transform_indices = @transform_2, window_bounds = array<i64: 1, 128>}, {pipeline_mode = #tpu.pipeline_mode<synchronous>, transform_indices = @transform_3, window_bounds = array<i64: 128, 128>}, {pipeline_mode = #tpu.pipeline_mode<synchronous>, transform_indices = @transform_4, window_bounds = array<i64: 1, 128>}, {transform_indices = @transform_5, window_bounds = array<i64: 16, 128>}]} {
    %c0 = arith.constant 0 : index
    %c0_0 = arith.constant 0 : index
    %0 = vector.load %arg1[%c0, %c0_0] : memref<16x128xf32, #tpu.memory_space<vmem>>, vector<16x128xf32>
    %c0_1 = arith.constant 0 : index
    %c0_2 = arith.constant 0 : index
    %1 = vector.load %arg2[%c0_1, %c0_2] : memref<128x128xf32, #tpu.memory_space<vmem>>, vector<128x128xf32>
    %cst = arith.constant dense<0.000000e+00> : vector<16x128xf32>
    %2 = tpu.matmul %0, %1, %cst {dimension_numbers = #tpu.dot_dimension_numbers<[1], [0], [0], [1], [0, 0, 1, 1], [], []>} : vector<16x128xf32>, vector<128x128xf32>, vector<16x128xf32> -> vector<16x128xf32>
    %c0_3 = arith.constant 0 : index
    %c0_4 = arith.constant 0 : index
    %3 = vector.load %arg3[%c0_3, %c0_4] : memref<1x128xf32, #tpu.memory_space<vmem>>, vector<1x128xf32>
    %4 = vector.broadcast %3 : vector<1x128xf32> to vector<16x128xf32>
    %5 = arith.addf %2, %4 : vector<16x128xf32>
    %cst_5 = arith.constant 0.000000e+00 : f32
    %6 = vector.broadcast %cst_5 : f32 to vector<16x128xf32>
    %7 = arith.maximumf %5, %6 : vector<16x128xf32>
    %c0_6 = arith.constant 0 : index
    %c0_7 = arith.constant 0 : index
    %8 = vector.load %arg4[%c0_6, %c0_7] : memref<128x128xf32, #tpu.memory_space<vmem>>, vector<128x128xf32>
    %cst_8 = arith.constant dense<0.000000e+00> : vector<16x128xf32>
    %9 = tpu.matmul %7, %8, %cst_8 {dimension_numbers = #tpu.dot_dimension_numbers<[1], [0], [0], [1], [0, 0, 1, 1], [], []>} : vector<16x128xf32>, vector<128x128xf32>, vector<16x128xf32> -> vector<16x128xf32>
    %c0_9 = arith.constant 0 : index
    %c0_10 = arith.constant 0 : index
    %10 = vector.load %arg5[%c0_9, %c0_10] : memref<1x128xf32, #tpu.memory_space<vmem>>, vector<1x128xf32>
    %11 = vector.broadcast %10 : vector<1x128xf32> to vector<16x128xf32>
    %12 = arith.addf %9, %11 : vector<16x128xf32>
    %c0_11 = arith.constant 0 : index
    %c0_12 = arith.constant 0 : index
    %13 = vector.load %arg6[%c0_11, %c0_12] : memref<16x128xf32, #tpu.memory_space<vmem>>, vector<16x128xf32>
    tpu.vector_store %arg6[%c0_11, %c0_12], %12 {strides = array<i32>} : memref<16x128xf32, #tpu.memory_space<vmem>>, vector<16x128xf32>,
    return
  }
  func.func @transform_0(%arg0: i32) -> (i32, i32) {
    %c0_i32 = arith.constant 0 : i32
    %c0_i32_0 = arith.constant 0 : i32
    return %arg0, %c0_i32 : i32, i32
  }
  func.func @transform_1(%arg0: i32) -> (i32, i32) {
    %c0_i32 = arith.constant 0 : i32
    %c0_i32_0 = arith.constant 0 : i32
    %c0_i32_1 = arith.constant 0 : i32
    return %c0_i32, %c0_i32_0 : i32, i32
  }
  func.func @transform_2(%arg0: i32) -> (i32, i32) {
    %c0_i32 = arith.constant 0 : i32
    %c0_i32_0 = arith.constant 0 : i32
    %c0_i32_1 = arith.constant 0 : i32
    return %c0_i32, %c0_i32_0 : i32, i32
  }
  func.func @transform_3(%arg0: i32) -> (i32, i32) {
    %c0_i32 = arith.constant 0 : i32
    %c0_i32_0 = arith.constant 0 : i32
    %c0_i32_1 = arith.constant 0 : i32
    return %c0_i32, %c0_i32_0 : i32, i32
  }
  func.func @transform_4(%arg0: i32) -> (i32, i32) {
    %c0_i32 = arith.constant 0 : i32
    %c0_i32_0 = arith.constant 0 : i32
    %c0_i32_1 = arith.constant 0 : i32
    return %c0_i32, %c0_i32_0 : i32, i32
  }
  func.func @transform_5(%arg0: i32) -> (i32, i32) {
    %c0_i32 = arith.constant 0 : i32
    %c0_i32_0 = arith.constant 0 : i32
    return %arg0, %c0_i32 : i32, i32
  }
}

</mosaic_0001>

<bundles_post_ra>
// kernel: my_mlp_forward.1
= control target key start
LH: loop header
LB: loop body
LE: loop exit
PB: predicated region body
PF: predicated region fallthrough
CT: control target
= control target key end

     0   :  { %s591_s0 = inlined_call_operand.vmem [shape: f32[16,128], index: 0, kind: input, shape index: {}]   ;;  %s592_s1 = inlined_call_operand.vmem [shape: f32[128,128], index: 1, kind: input, shape index: {}]   ;;  %s593_s2 = inlined_call_operand.vmem [shape: f32[1,128], index: 2, kind: input, shape index: {}]   ;;  %s594_s3 = inlined_call_operand.vmem [shape: f32[128,128], index: 3, kind: input, shape index: {}]   ;;  %s595_s4 = inlined_call_operand.vmem [shape: f32[1,128], index: 4, kind: input, shape index: {}]   ;;  %s596_s5 = inlined_call_operand.hbm [shape: f32[16,128], index: 5, kind: output, shape index: {}]  }
   0x1   :  { %v23_v0 = vld [vmem:[%s592_s1] sm:$0xff]  ;;  %v24_v1 = vld [vmem:[%s592_s1 + $0x8] sm:$0xff]  ;;  %v25_v2 = vld [vmem:[%s592_s1 + $0x10] sm:$0xff] }
   0x2   :  { %v347_v3 = vpack.c.bf16 %v24_v1, %v23_v0  ;;  %v26_v4 = vld [vmem:[%s592_s1 + $0x18] sm:$0xff]  ;;  %v27_v6 = vld [vmem:[%s592_s1 + $0x20] sm:$0xff]  ;;  %v28_v7 = vld [vmem:[%s592_s1 + $0x28] sm:$0xff] }
   0x3   :  { %v351_v5 = vpack.c.bf16 %v26_v4, %v25_v2  ;;  %v355_v8 = vpack.c.bf16 %v28_v7, %v27_v6  ;;  %v29_v9 = vld [vmem:[%s592_s1 + $0x30] sm:$0xff]  ;;  %v30_v10 = vld [vmem:[%s592_s1 + $0x38] sm:$0xff]  ;;  %v21_v11 = vld [vmem:[%s591_s0] sm:$0xff] }
   0x4   :  { %348 = vmatprep.subr.bf16.mxu0 %v347_v3  ;;  %309 = vmatprep.mubr.f32.mxu0 %v21_v11  ;;  %v123_v12 = vld [vmem:[%s594_s3] sm:$0xff]  ;;  %v124_v13 = vld [vmem:[%s594_s3 + $0x8] sm:$0xff]  ;;  %v125_v14 = vld [vmem:[%s594_s3 + $0x10] sm:$0xff]  ;;  %v359_v20 = vpack.c.bf16 %v30_v10, %v29_v9 }
   0x5   :  { %350 = vmatpush3.bf16.msra.mxu0 %v347_v3  ;;  %v379_v15 = vpack.c.bf16 %v124_v13, %v123_v12  ;;  %v126_v16 = vld [vmem:[%s594_s3 + $0x18] sm:$0xff]  ;;  %v127_v18 = vld [vmem:[%s594_s3 + $0x20] sm:$0xff]  ;;  %v128_v19 = vld [vmem:[%s594_s3 + $0x28] sm:$0xff] }
   0x6   :  { %352 = vmatprep.subr.bf16.mxu0 %v351_v5  ;;  %v383_v17 = vpack.c.bf16 %v126_v16, %v125_v14  ;;  %v31_v21 = vld [vmem:[%s592_s1 + $0x40] sm:$0xff]  ;;  %v32_v22 = vld [vmem:[%s592_s1 + $0x48] sm:$0xff] }
   0x7   :  { %380 = vmatprep.subr.bf16.mxu1 %v379_v15 }
   0x8   :  { %382 = vmatpush3.bf16.msra.mxu1 %v379_v15 }
   0x9   :  { %354 = vmatpush3.bf16.msra.mxu0 %v351_v5 }
   0xa   :  { %356 = vmatprep.subr.bf16.mxu0 %v355_v8 }
   0xb   :  { %10 = vsyncpa [#allocation3], 0  ;;  %384 = vmatprep.subr.bf16.mxu1 %v383_v17  ;;  %v387_v23 = vpack.c.bf16 %v128_v19, %v127_v18  ;;  %v129_v24 = vld [vmem:[%s594_s3 + $0x30] sm:$0xff]  ;;  %v130_v25 = vld [vmem:[%s594_s3 + $0x38] sm:$0xff]  ;;  %v363_v26 = vpack.c.bf16 %v32_v22, %v31_v21 }
   0xc   :  { %v33_v27 = vld [vmem:[%s592_s1 + $0x50] sm:$0xff]  ;;  %v34_v28 = vld [vmem:[%s592_s1 + $0x58] sm:$0xff]  ;;  %386 = vmatpush3.bf16.msra.mxu1 %v383_v17  ;;  %v391_v29 = vpack.c.bf16 %v130_v25, %v129_v24  ;;  %v131_v30 = vld [vmem:[%s594_s3 + $0x40] sm:$0xff] }
   0xd   :  { %358 = vmatpush3.bf16.msra.mxu0 %v355_v8  ;;  %388 = vmatprep.subr.bf16.mxu1 %v387_v23  ;;  %v132_v31 = vld [vmem:[%s594_s3 + $0x48] sm:$0xff]  ;;  %v367_v32 = vpack.c.bf16 %v34_v28, %v33_v27  ;;  %v35_v33 = vld [vmem:[%s592_s1 + $0x60] sm:$0xff]  ;;  %v133_v36 = vld [vmem:[%s594_s3 + $0x50] sm:$0xff] }
   0xe   :  { %360 = vmatprep.subr.bf16.mxu0 %v359_v20  ;;  %v36_v34 = vld [vmem:[%s592_s1 + $0x68] sm:$0xff]  ;;  %v395_v35 = vpack.c.bf16 %v132_v31, %v131_v30  ;;  %v134_v37 = vld [vmem:[%s594_s3 + $0x58] sm:$0xff]  ;;  %v37_v39 = vld [vmem:[%s592_s1 + $0x70] sm:$0xff] }
   0xf   :  { %v371_v38 = vpack.c.bf16 %v36_v34, %v35_v33  ;;  %v38_v40 = vld [vmem:[%s592_s1 + $0x78] sm:$0xff]  ;;  %v399_v41 = vpack.c.bf16 %v134_v37, %v133_v36  ;;  %v135_v42 = vld [vmem:[%s594_s3 + $0x60] sm:$0xff]  ;;  %v136_v43 = vld [vmem:[%s594_s3 + $0x68] sm:$0xff] }
  0x10   :  { %390 = vmatpush3.bf16.msra.mxu1 %v387_v23  ;;  %v375_v44 = vpack.c.bf16 %v38_v40, %v37_v39  ;;  %v403_v45 = vpack.c.bf16 %v136_v43, %v135_v42  ;;  %v22_v46 = vld [vmem:[%s591_s0 + $0x8] sm:$0xff]  ;;  %v137_v47 = vld [vmem:[%s594_s3 + $0x70] sm:$0xff]  ;;  %v138_v48 = vld [vmem:[%s594_s3 + $0x78] sm:$0xff]  ;;  %s438_s3 = smov [#allocation2]  }
  0x11   :  { %362 = vmatpush3.bf16.msra.mxu0 %v359_v20  ;;  %392 = vmatprep.subr.bf16.mxu1 %v391_v29  ;;  %v407_v49 = vpack.c.bf16 %v138_v48, %v137_v47  ;;  %v239_v50 = vld [vmem:[%s593_s2] ss:$0 sm:$0xff]  ;;  %s228_s13 = sshll.u32 %s438_s3, 4  ;;  %s229_s13 = int_to_ptr.vmem [resolvable:$true] %s228_s13 }
  0x12   :  { %364 = vmatprep.subr.bf16.mxu0 %v363_v26  ;;  %v240_v57 = vld [vmem:[%s595_s4] ss:$0 sm:$0xff]  ;;  %s414_s2 = scalar_lea.vmem %s229_s13, 256  ;;  %p419_p1 = scmp.lt.s32.totalorder %s229_s13, %s229_s13 }
  0x13   :  { %p415_p0 = scmp.ne.s32.totalorder %s229_s13, %s414_s2  ;;  %p420_p2 = scmp.lt.s32.totalorder %s414_s2, %s414_s2 }
  0x14   :  { %394 = vmatpush3.bf16.msra.mxu1 %v391_v29 }
  0x15   :  { %366 = vmatpush3.bf16.msra.mxu0 %v363_v26  ;;  %396 = vmatprep.subr.bf16.mxu1 %v395_v35  ;;  %p421_p3 = por %p420_p2, %p419_p1 }
  0x16   :  { %368 = vmatprep.subr.bf16.mxu0 %v367_v32 }
  0x17   :  { %p422_p4 = pnand %p421_p3, %p415_p0 }
  0x18   :  { %398 = vmatpush3.bf16.msra.mxu1 %v395_v35 }
  0x19   :  { %370 = vmatpush3.bf16.msra.mxu0 %v367_v32  ;;  %400 = vmatprep.subr.bf16.mxu1 %v399_v41 }
  0x1a   :  { %372 = vmatprep.subr.bf16.mxu0 %v371_v38 }
  0x1c   :  { %402 = vmatpush3.bf16.msra.mxu1 %v399_v41 }
  0x1d   :  { %374 = vmatpush3.bf16.msra.mxu0 %v371_v38  ;;  %404 = vmatprep.subr.bf16.mxu1 %v403_v45 }
  0x1e   :  { %376 = vmatprep.subr.bf16.mxu0 %v375_v44 }
  0x20   :  { %406 = vmatpush3.bf16.msra.mxu1 %v403_v45 }
  0x21   :  { %378 = vmatpush3.bf16.msra.mxu0 %v375_v44  ;;  %408 = vmatprep.subr.bf16.mxu1 %v407_v49 }
  0x24   :  { %310 = vmatmul.mubr.f32.vlgmr.msra.gmra.mrb[0].mxu0 %v22_v46  ;;  %410 = vmatpush3.bf16.msra.mxu1 %v407_v49 }
  0xf7   :  { %v311_v51 = vpop.f32.mrb[0].mxu0 }
  0xf8   :  { %v118_v52 = vadd.f32 %v311_v51, %v239_v50  ;;  %v112_v53 = vpop.f32.mrb[1].mxu0 }
  0xf9   :  { %v113_v54 = vadd.f32 %v239_v50, %v112_v53 }
  0xfa   :  { %v122_v56 = vmax.f32 %v118_v52, 0.0 }
  0xfb   :  { %v121_v55 = vmax.f32 %v113_v54, 0.0 }
  0xfd   :  { %344 = vmatprep.mubr.f32.mxu1 %v121_v55 }
  0xfe   :  { %345 = vmatmul.mubr.f32.vlgmr.msra.gmra.mrb[0].mxu1 %v122_v56 }
 0x1d1   :  { %v346_v58 = vpop.f32.mrb[0].mxu1 }
 0x1d2   :  { %v218_v59 = vadd.f32 %v346_v58, %v240_v57  ;;  %v212_v60 = vpop.f32.mrb[1].mxu1 }
 0x1d3   :  { %v213_v61 = vadd.f32 %v240_v57, %v212_v60 }
 0x1d4   :  { %222 = vst [vmem:[#allocation2 + $0x8] sm:$0xff] %v218_v59 }
 0x1d5   :  { %221 = vst [vmem:[#allocation2] sm:$0xff] %v213_v61 }
 0x1d6   :  { %425 = shalt.err (!%p422_p4)
}
 0x1d7   :  { %s426_s4 = scalar_lea.hbm %s596_s5, 256 }
 0x1d8   :  { %p427_p5 = scmp.ne.s32.totalorder %s596_s5, %s426_s4  ;;  %p430_p6 = scmp.lt.u32.totalorder %s426_s4, %s596_s5 }
 0x1da   :  { %p432_p7 = pnand %p430_p6, %p427_p5 }
 0x1dc   :  { %435 = shalt.err (!%p432_p7)
}
 0x1dd   :  { %s439_s20 = smov 128   ;;  %s440_s21 = smov 8  }
 0x1de   :  { %234 = dma.vmem_to_hbm [thread:$0]  %s229_s13, 256, %s596_s5, [#allocation3], %s439_s20, %s439_s20, %s440_s21  }
 0x1df   :  { %436 = dma.done.wait [#allocation3], 256  }
 0x1e0   :  { %437 = vsyncadd [#allocation3], 4294967040 }
 0x1e1   :  { %238 = vsyncpa [#allocation3], 1 }

</bundles_post_ra>
